<compile_context>
chip_gen: v6e
topology: v6e:2x2x1
jax: 0.10.0
libtpu: 0.0.40
codegen_flags: <defaults>
</compile_context>

<pallas_src>
import jax
import jax.numpy as jnp
from jax.experimental import pallas as pl
from jax.experimental.pallas import tpu as pltpu

IN_F = 28 * 28      # 784
H1_P = 128          # 100 -> padded to 128
H2_P = 128          # 50  -> padded to 128
OUT_P = 128         # 10  -> padded to 128
DEFAULT_TB = 1024   # batch tile (rows); sweep 512/1024/2048 if desired


def _round_up(x, m):
    return ((x + m - 1) // m) * m


def _mlp_kernel(x_ref, w1_ref, b1_ref, w2_ref, b2_ref, w3_ref, b3_ref, o_ref):
    # x_ref: (TB, 784) f32 straight from HBM (single pass); cast to bf16 in-kernel.
    # w*: bf16, padded to lane multiples; b*: (1, 128) f32; o_ref: (TB, 128) bf16.
    x = x_ref[...].astype(jnp.bfloat16)

    h1 = jnp.dot(x, w1_ref[...], preferred_element_type=jnp.float32) + b1_ref[...]
    h1 = jnp.maximum(h1, 0.0).astype(jnp.bfloat16)          # ReLU, bf16 for next MXU pass

    h2 = jnp.dot(h1, w2_ref[...], preferred_element_type=jnp.float32) + b2_ref[...]
    h2 = jnp.maximum(h2, 0.0).astype(jnp.bfloat16)          # ReLU

    h3 = jnp.dot(h2, w3_ref[...], preferred_element_type=jnp.float32) + b3_ref[...]
    o_ref[...] = h3.astype(o_ref.dtype)                     # bf16, lane-dense store


def prepare_params(params):
    """One-time parameter prep: transpose to (in, out), zero-pad to lane multiples,
    cast weights to bf16.  Done OUTSIDE the per-call path."""
    def pad2d(a, rows, cols):
        return jnp.pad(a, ((0, rows - a.shape[0]), (0, cols - a.shape[1])))

    w1t = pad2d(params["w1"].T, IN_F, H1_P).astype(jnp.bfloat16)    # (784, 128)
    w2t = pad2d(params["w2"].T, H1_P, H2_P).astype(jnp.bfloat16)    # (128, 128)
    w3t = pad2d(params["w3"].T, H2_P, OUT_P).astype(jnp.bfloat16)   # (128, 128)
    b1 = jnp.pad(params["b1"], (0, H1_P - params["b1"].shape[0])).reshape(1, -1).astype(jnp.float32)
    b2 = jnp.pad(params["b2"], (0, H2_P - params["b2"].shape[0])).reshape(1, -1).astype(jnp.float32)
    b3 = jnp.pad(params["b3"], (0, OUT_P - params["b3"].shape[0])).reshape(1, -1).astype(jnp.float32)
    return {"w1": w1t, "b1": b1, "w2": w2t, "b2": b2, "w3": w3t, "b3": b3}


@jax.jit
def my_neural_net_forward(x_nchw, prepared):
    """Forward pass equivalent to myNeuralNet.forward.

    x_nchw:   (B, 1, 28, 28) float32 (any leading shape whose trailing elems == 784)
    prepared: output of prepare_params(params)
    returns:  squeeze of (B, 10) f32 logits, matching x3.squeeze()
    """
    b = x_nchw.shape[0]
    x2d = x_nchw.reshape(b, IN_F)                            # f32; no wrapper-side cast

    # Batch tile: multiple of 16 (bf16 output packing); target >= 2 grid steps for
    # large b so the 'parallel' axis can use both v7x TensorCores.
    tb = min(DEFAULT_TB, max(16, _round_up(pl.cdiv(b, 2), 16)))
    grid = (pl.cdiv(b, tb),)                                 # partial last tile handled by Pallas

    const = lambda shape: pl.BlockSpec(shape, lambda i: (0, 0))   # VMEM-resident operand

    out = pl.pallas_call(
        _mlp_kernel,
        out_shape=jax.ShapeDtypeStruct((b, OUT_P), jnp.bfloat16),
        grid_spec=pltpu.PrefetchScalarGridSpec(
            num_scalar_prefetch=0,
            grid=grid,
            in_specs=[
                pl.BlockSpec((tb, IN_F), lambda i: (i, 0)),  # x: tiled over batch (f32)
                const((IN_F, H1_P)), const((1, H1_P)),       # layer 1 (resident)
                const((H1_P, H2_P)), const((1, H2_P)),       # layer 2 (resident)
                const((H2_P, OUT_P)), const((1, OUT_P)),     # layer 3 (resident)
            ],
            out_specs=pl.BlockSpec((tb, OUT_P), lambda i: (i, 0)),
        ),
        compiler_params=pltpu.CompilerParams(
            dimension_semantics=("parallel",)),              # megacore-shardable on v7x
    )(x2d, prepared["w1"], prepared["b1"], prepared["w2"],
      prepared["b2"], prepared["w3"], prepared["b3"])

    logits = out[:, :10].astype(jnp.float32)                 # drop lane padding (40 B/row)
    return jnp.squeeze(logits)                               # x3.squeeze()


def init_params(key):
    """Deterministic init mirroring nn.Linear shapes (Kaiming-uniform-ish)."""
    ks = jax.random.split(key, 6)

    def linear(kw, kb, out_f, in_f):
        bound = 1.0 / jnp.sqrt(in_f)
        w = jax.random.uniform(kw, (out_f, in_f), jnp.float32, -bound, bound)
        b = jax.random.uniform(kb, (out_f,), jnp.float32, -bound, bound)
        return w, b

    w1, b1 = linear(ks[0], ks[1], 100, IN_F)
    w2, b2 = linear(ks[2], ks[3], 50, 100)
    w3, b3 = linear(ks[4], ks[5], 10, 50)
    return {"w1": w1, "b1": b1, "w2": w2, "b2": b2, "w3": w3, "b3": b3}


def _reference_forward_bf16(x_nchw, prepared):
    """Pure-JAX reference matching the kernel's bf16-storage / f32-accumulate math."""
    x = x_nchw.reshape(x_nchw.shape[0], IN_F).astype(jnp.bfloat16)
    h1 = jnp.maximum(jnp.dot(x, prepared["w1"], preferred_element_type=jnp.float32)
                     + prepared["b1"], 0.0).astype(jnp.bfloat16)
    h2 = jnp.maximum(jnp.dot(h1, prepared["w2"], preferred_element_type=jnp.float32)
                     + prepared["b2"], 0.0).astype(jnp.bfloat16)
    h3 = (jnp.dot(h2, prepared["w3"], preferred_element_type=jnp.float32)
          + prepared["b3"]).astype(jnp.bfloat16)             # match kernel's bf16 writeback
    return jnp.squeeze(h3[:, :10].astype(jnp.float32))


def _reference_forward_f32(x_nchw, p):
    """Pure-f32 reference of the original PyTorch forward."""
    x = x_nchw.reshape(x_nchw.shape[0], IN_F)
    h1 = jnp.maximum(x @ p["w1"].T + p["b1"], 0.0)
    h2 = jnp.maximum(h1 @ p["w2"].T + p["b2"], 0.0)
    return jnp.squeeze(h2 @ p["w3"].T + p["b3"])


if __name__ == "__main__":
    key = jax.random.PRNGKey(0)
    k_params, k_x = jax.random.split(key)

    params = init_params(k_params)
    prepared = prepare_params(params)           # one-time prep (transpose / pad / bf16)

    # Small batch of MNIST-shaped inputs, NCHW like PyTorch: (B, 1, 28, 28)
    x = jax.random.normal(k_x, (2, 1, 28, 28), dtype=jnp.float32)

    y = jax.block_until_ready(my_neural_net_forward(x, prepared))
    assert y.shape == (2, 10), y.shape

    # Exact-math check (same bf16 rounding as the kernel, f32 accumulation).
    y_bf = _reference_forward_bf16(x, prepared)
    assert jnp.allclose(y, y_bf, atol=2e-2, rtol=2e-2), "mismatch vs bf16 reference"

    # Loose check vs the original f32 PyTorch-equivalent math (bf16 storage error).
    y_f32 = _reference_forward_f32(x, params)
    assert jnp.allclose(y, y_f32, atol=5e-2, rtol=5e-2), "mismatch vs f32 reference"

    # Larger batch: exercises a 2-step grid with a partial last tile.
    x_big = jax.random.normal(jax.random.PRNGKey(1), (100, 1, 28, 28), dtype=jnp.float32)
    y_big = jax.block_until_ready(my_neural_net_forward(x_big, prepared))
    assert y_big.shape == (100, 10), y_big.shape
    assert jnp.allclose(y_big, _reference_forward_bf16(x_big, prepared),
                        atol=2e-2, rtol=2e-2), "mismatch vs bf16 reference (b=100)"
    assert jnp.allclose(y_big, _reference_forward_f32(x_big, params),
                        atol=5e-2, rtol=5e-2), "mismatch vs f32 reference (b=100)"

    print("KERNEL_OK")
</pallas_src>

<mosaic_0001>
module attributes {stable_mosaic.version = 11 : i64} {
  func.func @_mlp_kernel(%arg0: i32, %arg1: memref<16x784xf32, #tpu.memory_space<vmem>>, %arg2: memref<784x128xbf16, #tpu.memory_space<vmem>>, %arg3: memref<1x128xf32, #tpu.memory_space<vmem>>, %arg4: memref<128x128xbf16, #tpu.memory_space<vmem>>, %arg5: memref<1x128xf32, #tpu.memory_space<vmem>>, %arg6: memref<128x128xbf16, #tpu.memory_space<vmem>>, %arg7: memref<1x128xf32, #tpu.memory_space<vmem>>, %arg8: memref<16x128xbf16, #tpu.memory_space<vmem>>) attributes {dimension_semantics = [#tpu.dimension_semantics<parallel>], iteration_bounds = array<i64: 1>, scalar_prefetch = 0 : i64, scratch_operands = 0 : i64, tpu.core_type = #tpu.core_type<tc>, window_params = [{transform_indices = @transform_0, window_bounds = array<i64: 16, 784>}, {pipeline_mode = #tpu.pipeline_mode<synchronous>, transform_indices = @transform_1, window_bounds = array<i64: 784, 128>}, {pipeline_mode = #tpu.pipeline_mode<synchronous>, transform_indices = @transform_2, window_bounds = array<i64: 1, 128>}, {pipeline_mode = #tpu.pipeline_mode<synchronous>, transform_indices = @transform_3, window_bounds = array<i64: 128, 128>}, {pipeline_mode = #tpu.pipeline_mode<synchronous>, transform_indices = @transform_4, window_bounds = array<i64: 1, 128>}, {pipeline_mode = #tpu.pipeline_mode<synchronous>, transform_indices = @transform_5, window_bounds = array<i64: 128, 128>}, {pipeline_mode = #tpu.pipeline_mode<synchronous>, transform_indices = @transform_6, window_bounds = array<i64: 1, 128>}, {transform_indices = @transform_7, window_bounds = array<i64: 16, 128>}]} {
    %c0 = arith.constant 0 : index
    %c0_0 = arith.constant 0 : index
    %0 = vector.load %arg1[%c0, %c0_0] : memref<16x784xf32, #tpu.memory_space<vmem>>, vector<16x784xf32>
    %1 = arith.truncf %0 : vector<16x784xf32> to vector<16x784xbf16>
    %c0_1 = arith.constant 0 : index
    %c0_2 = arith.constant 0 : index
    %2 = vector.load %arg2[%c0_1, %c0_2] : memref<784x128xbf16, #tpu.memory_space<vmem>>, vector<784x128xbf16>
    %cst = arith.constant dense<0.000000e+00> : vector<16x128xf32>
    %3 = tpu.matmul %1, %2, %cst {dimension_numbers = #tpu.dot_dimension_numbers<[1], [0], [0], [1], [0, 0, 1, 1], [], []>} : vector<16x784xbf16>, vector<784x128xbf16>, vector<16x128xf32> -> vector<16x128xf32>
    %c0_3 = arith.constant 0 : index
    %c0_4 = arith.constant 0 : index
    %4 = vector.load %arg3[%c0_3, %c0_4] : memref<1x128xf32, #tpu.memory_space<vmem>>, vector<1x128xf32>
    %5 = vector.broadcast %4 : vector<1x128xf32> to vector<16x128xf32>
    %6 = arith.addf %3, %5 : vector<16x128xf32>
    %cst_5 = arith.constant 0.000000e+00 : f32
    %7 = vector.broadcast %cst_5 : f32 to vector<16x128xf32>
    %8 = arith.maximumf %6, %7 : vector<16x128xf32>
    %9 = arith.truncf %8 : vector<16x128xf32> to vector<16x128xbf16>
    %c0_6 = arith.constant 0 : index
    %c0_7 = arith.constant 0 : index
    %10 = vector.load %arg4[%c0_6, %c0_7] : memref<128x128xbf16, #tpu.memory_space<vmem>>, vector<128x128xbf16>
    %cst_8 = arith.constant dense<0.000000e+00> : vector<16x128xf32>
    %11 = tpu.matmul %9, %10, %cst_8 {dimension_numbers = #tpu.dot_dimension_numbers<[1], [0], [0], [1], [0, 0, 1, 1], [], []>} : vector<16x128xbf16>, vector<128x128xbf16>, vector<16x128xf32> -> vector<16x128xf32>
    %c0_9 = arith.constant 0 : index
    %c0_10 = arith.constant 0 : index
    %12 = vector.load %arg5[%c0_9, %c0_10] : memref<1x128xf32, #tpu.memory_space<vmem>>, vector<1x128xf32>
    %13 = vector.broadcast %12 : vector<1x128xf32> to vector<16x128xf32>
    %14 = arith.addf %11, %13 : vector<16x128xf32>
    %cst_11 = arith.constant 0.000000e+00 : f32
    %15 = vector.broadcast %cst_11 : f32 to vector<16x128xf32>
    %16 = arith.maximumf %14, %15 : vector<16x128xf32>
    %17 = arith.truncf %16 : vector<16x128xf32> to vector<16x128xbf16>
    %c0_12 = arith.constant 0 : index
    %c0_13 = arith.constant 0 : index
    %18 = vector.load %arg6[%c0_12, %c0_13] : memref<128x128xbf16, #tpu.memory_space<vmem>>, vector<128x128xbf16>
    %cst_14 = arith.constant dense<0.000000e+00> : vector<16x128xf32>
    %19 = tpu.matmul %17, %18, %cst_14 {dimension_numbers = #tpu.dot_dimension_numbers<[1], [0], [0], [1], [0, 0, 1, 1], [], []>} : vector<16x128xbf16>, vector<128x128xbf16>, vector<16x128xf32> -> vector<16x128xf32>
    %c0_15 = arith.constant 0 : index
    %c0_16 = arith.constant 0 : index
    %20 = vector.load %arg7[%c0_15, %c0_16] : memref<1x128xf32, #tpu.memory_space<vmem>>, vector<1x128xf32>
    %21 = vector.broadcast %20 : vector<1x128xf32> to vector<16x128xf32>
    %22 = arith.addf %19, %21 : vector<16x128xf32>
    %23 = arith.truncf %22 : vector<16x128xf32> to vector<16x128xbf16>
    %c0_17 = arith.constant 0 : index
    %c0_18 = arith.constant 0 : index
    %24 = vector.load %arg8[%c0_17, %c0_18] : memref<16x128xbf16, #tpu.memory_space<vmem>>, vector<16x128xbf16>
    tpu.vector_store %arg8[%c0_17, %c0_18], %23 {strides = array<i32>} : memref<16x128xbf16, #tpu.memory_space<vmem>>, vector<16x128xbf16>,
    return
  }
  func.func @transform_0(%arg0: i32) -> (i32, i32) {
    %c0_i32 = arith.constant 0 : i32
    %c0_i32_0 = arith.constant 0 : i32
    return %arg0, %c0_i32 : i32, i32
  }
  func.func @transform_1(%arg0: i32) -> (i32, i32) {
    %c0_i32 = arith.constant 0 : i32
    %c0_i32_0 = arith.constant 0 : i32
    %c0_i32_1 = arith.constant 0 : i32
    return %c0_i32, %c0_i32_0 : i32, i32
  }
  func.func @transform_2(%arg0: i32) -> (i32, i32) {
    %c0_i32 = arith.constant 0 : i32
    %c0_i32_0 = arith.constant 0 : i32
    %c0_i32_1 = arith.constant 0 : i32
    return %c0_i32, %c0_i32_0 : i32, i32
  }
  func.func @transform_3(%arg0: i32) -> (i32, i32) {
    %c0_i32 = arith.constant 0 : i32
    %c0_i32_0 = arith.constant 0 : i32
    %c0_i32_1 = arith.constant 0 : i32
    return %c0_i32, %c0_i32_0 : i32, i32
  }
  func.func @transform_4(%arg0: i32) -> (i32, i32) {
    %c0_i32 = arith.constant 0 : i32
    %c0_i32_0 = arith.constant 0 : i32
    %c0_i32_1 = arith.constant 0 : i32
    return %c0_i32, %c0_i32_0 : i32, i32
  }
  func.func @transform_5(%arg0: i32) -> (i32, i32) {
    %c0_i32 = arith.constant 0 : i32
    %c0_i32_0 = arith.constant 0 : i32
    %c0_i32_1 = arith.constant 0 : i32
    return %c0_i32, %c0_i32_0 : i32, i32
  }
  func.func @transform_6(%arg0: i32) -> (i32, i32) {
    %c0_i32 = arith.constant 0 : i32
    %c0_i32_0 = arith.constant 0 : i32
    %c0_i32_1 = arith.constant 0 : i32
    return %c0_i32, %c0_i32_0 : i32, i32
  }
  func.func @transform_7(%arg0: i32) -> (i32, i32) {
    %c0_i32 = arith.constant 0 : i32
    %c0_i32_0 = arith.constant 0 : i32
    return %arg0, %c0_i32 : i32, i32
  }
}

</mosaic_0001>

<bundles_post_ra>
// kernel: my_neural_net_forward.1
= control target key start
LH: loop header
LB: loop body
LE: loop exit
PB: predicated region body
PF: predicated region fallthrough
CT: control target
= control target key end

     0   :  { %12 = vsyncpa [#allocation3], 0  ;;  %s1466_s24 = smov [#allocation2]   ;;  %s1670_s0 = inlined_call_operand.vmem [shape: f32[2,784], index: 0, kind: input, shape index: {}]   ;;  %s1671_s1 = inlined_call_operand.hbm [shape: bf16[784,128], index: 1, kind: input, shape index: {}]   ;;  %s1672_s2 = inlined_call_operand.vmem [shape: f32[1,128], index: 2, kind: input, shape index: {}]   ;;  %s1673_s3 = inlined_call_operand.vmem [shape: bf16[128,128], index: 3, kind: input, shape index: {}]   ;;  %s1674_s4 = inlined_call_operand.vmem [shape: f32[1,128], index: 4, kind: input, shape index: {}]   ;;  %s1675_s5 = inlined_call_operand.vmem [shape: bf16[128,128], index: 5, kind: input, shape index: {}]   ;;  %s1676_s6 = inlined_call_operand.vmem [shape: f32[1,128], index: 6, kind: input, shape index: {}]   ;;  %s1677_s7 = inlined_call_operand.vmem [shape: bf16[2,128], index: 7, kind: output, shape index: {}]  }
   0x1   :  { %s20_s25 = sshll.u32 %s1466_s24, 4  ;;  %s21_s25 = int_to_ptr.vmem [resolvable:$true] %s20_s25 }
   0x2   :  { %s1452_s26 = scalar_lea.vmem %s21_s25, 6272  ;;  %p1457_p1 = scmp.lt.s32.totalorder %s21_s25, %s21_s25 }
   0x3   :  { %p1453_p0 = scmp.ne.s32.totalorder %s21_s25, %s1452_s26  ;;  %p1458_p2 = scmp.lt.s32.totalorder %s1452_s26, %s1452_s26 }
   0x5   :  { %p1459_p3 = por %p1458_p2, %p1457_p1 }
   0x7   :  { %p1460_p4 = pnand %p1459_p3, %p1453_p0 }
   0x9   :  { %1463 = shalt.err (!%p1460_p4)
}
   0xa   :  { %s1467_s27 = smov 64   ;;  %s1468_s28 = smov 4  }
   0xb   :  { %26 = dma.hbm_to_vmem [thread:$0]  %s1671_s1, 6272, %s21_s25, [#allocation3], %s1467_s27, %s1467_s27, %s1468_s28  }
   0xc   :  { %1464 = dma.done.wait [#allocation3], 6272  }
   0xd   :  { %1465 = vsyncadd [#allocation3], 4294961024  ;;  %v1355_v0 = vld [vmem:[#allocation2 + $0x78] sm:$0xff]   ;;  %v1359_v4 = vld [vmem:[#allocation2 + $0x70] sm:$0xff]   ;;  %v1469_v24 = vmov 1983009808   ;;  %v80_v26 = vlaneseq }
   0xe   :  { %v1356_v1 = vld [vmem:[#allocation2 + $0x38] sm:$0xff]   ;;  %1216 = vmatprep.subr.bf16.mxu0 %v1355_v0  ;;  %v1360_v5 = vld [vmem:[#allocation2 + $0x30] sm:$0xff]   ;;  %v1363_v8 = vld [vmem:[#allocation2 + $0x68] sm:$0xff]   ;;  %v78_v25 = vunpack.c.l.s4 %v1469_v24  ;;  %v1470_v58 = vmov 0.0   ;;  %vm1471_vm0 = vmmov 0   ;;  %vm635_vm1 = vcmask 130048  }
   0xf   :  { %v1357_v2 = vld [vmem:[#allocation2 + $0xf8] sm:$0xff]   ;;  %1217 = vmatpush3.bf16.msra.mxu0 %v1356_v1  ;;  %v1361_v6 = vld [vmem:[#allocation2 + $0xf0] sm:$0xff]   ;;  %v1364_v9 = vld [vmem:[#allocation2 + $0x28] sm:$0xff]   ;;  %v1516_v32 = vshrl.u32 %v80_v26, 7 }
  0x10   :  { %v1358_v3 = vld [vmem:[#allocation2 + $0xb8] sm:$0xff]   ;;  %1238 = vmatprep.subr.bf16.mxu1 %v1357_v2  ;;  %1218 = vmatprep.subr.bf16.mxu0 %v1359_v4  ;;  %v1362_v7 = vld [vmem:[#allocation2 + $0xb0] sm:$0xff]   ;;  %v1365_v10 = vld [vmem:[#allocation2 + $0xe8] sm:$0xff]   ;;  %v79_v31 = vunpack.c.0.s8 %v78_v25 }
  0x11   :  { %1239 = vmatpush3.bf16.msra.mxu1 %v1358_v3  ;;  %v1366_v11 = vld [vmem:[#allocation2 + $0xa8] sm:$0xff]   ;;  %v1367_v12 = vld [vmem:[#allocation2 + $0x60] sm:$0xff]   ;;  %v1371_v16 = vld [vmem:[#allocation2 + $0x58] sm:$0xff]  }
  0x12   :  { %1240 = vmatprep.subr.bf16.mxu1 %v1361_v6  ;;  %v1368_v13 = vld [vmem:[#allocation2 + $0x20] sm:$0xff]   ;;  %v1372_v17 = vld [vmem:[#allocation2 + $0x18] sm:$0xff]   ;;  %v1375_v20 = vld [vmem:[#allocation2 + $0x50] sm:$0xff]   ;;  %v1519_v36 = vsub.s32 %v79_v31, %v1516_v32 }
  0x13   :  { %1219 = vmatpush3.bf16.msra.mxu0 %v1360_v5  ;;  %v1369_v14 = vld [vmem:[#allocation2 + $0xe0] sm:$0xff]   ;;  %v1373_v18 = vld [vmem:[#allocation2 + $0xd8] sm:$0xff]   ;;  %v1376_v21 = vld [vmem:[#allocation2 + $0x10] sm:$0xff]  }
  0x14   :  { %1220 = vmatprep.subr.bf16.mxu0 %v1363_v8  ;;  %v1370_v15 = vld [vmem:[#allocation2 + $0xa0] sm:$0xff]   ;;  %v1374_v19 = vld [vmem:[#allocation2 + $0x98] sm:$0xff]   ;;  %v1377_v22 = vld [vmem:[#allocation2 + $0xd0] sm:$0xff]  }
  0x15   :  { %1241 = vmatpush3.bf16.msra.mxu1 %v1362_v7  ;;  %v1378_v23 = vld [vmem:[#allocation2 + $0x90] sm:$0xff]   ;;  %v1379_v27 = vld [vmem:[#allocation2 + $0x48] sm:$0xff]   ;;  %v1383_v33 = vld [vmem:[#allocation2 + $0x40] sm:$0xff]  }
  0x16   :  { %1242 = vmatprep.subr.bf16.mxu1 %v1365_v10  ;;  %v1380_v28 = vld [vmem:[#allocation2 + $0x8] sm:$0xff]   ;;  %v1384_v34 = vld [vmem:[#allocation2] sm:$0xff]   ;;  %v1395_v46 = vld [vmem:[#allocation2 + $0x178] sm:$0xff]  }
  0x17   :  { %1221 = vmatpush3.bf16.msra.mxu0 %v1364_v9  ;;  %v1381_v29 = vld [vmem:[#allocation2 + $0xc8] sm:$0xff]   ;;  %v1385_v35 = vld [vmem:[#allocation2 + $0xc0] sm:$0xff]   ;;  %v1400_v62 = vld [vmem:[#allocation2 + $0x138] sm:$0xff]  }
  0x18   :  { %1222 = vmatprep.subr.bf16.mxu0 %v1367_v12  ;;  %v1382_v30 = vld [vmem:[#allocation2 + $0x88] sm:$0xff]   ;;  %v1392_v40 = vld [vmem:[%s1670_s0 + $0x54] ss:$14 sps:$4 sm:$0xff]   ;;  %v1408_v12 = vld [vmem:[#allocation2 + $0x118] sm:$0xff]  }
  0x19   :  { %1243 = vmatpush3.bf16.msra.mxu1 %v1366_v11  ;;  %v1386_v37 = vld [vmem:[%s1670_s0] ss:$14 sps:$4 sm:$0xff]   ;;  %v1388_v38 = vld [vmem:[%s1670_s0 + $0x1c] ss:$14 sps:$4 sm:$0xff]   ;;  %v1390_v39 = vld [vmem:[%s1670_s0 + $0x38] ss:$14 sps:$4 sm:$0xff]   ;;  %v168_v45 = vrot.slane %v1392_v40, %v1519_v36 }
  0x1a   :  { %1244 = vmatprep.subr.bf16.mxu1 %v1369_v14  ;;  %v83_v41 = vrot.slane %v1386_v37, %v1519_v36  ;;  %v1394_v42 = vld [vmem:[#allocation2 + $0x80] sm:$0xff]   ;;  %v97_v43 = vrot.slane %v1388_v38, %v1519_v36  ;;  %v154_v44 = vrot.slane %v1390_v39, %v1519_v36  ;;  %v1398_v49 = vld [vmem:[%s1670_s0 + $0x3c] ss:$14 sps:$4 sm:$0xff]   ;;  %v1401_v1 = vld [vmem:[#allocation2 + $0x170] sm:$0xff]  }
  0x1b   :  { %1223 = vmatpush3.bf16.msra.mxu0 %v1368_v13  ;;  %v1396_v47 = vld [vmem:[%s1670_s0 + $0x4] ss:$14 sps:$4 sm:$0xff]   ;;  %v1397_v48 = vld [vmem:[%s1670_s0 + $0x20] ss:$14 sps:$4 sm:$0xff]   ;;  %v161_v57 = vrot.slane %v1398_v49, %v1519_v36  ;;  %v1407_v11 = vld [vmem:[#allocation2 + $0x158] sm:$0xff]  }
  0x1c   :  { %1224 = vmatprep.subr.bf16.mxu0 %v1371_v16  ;;  %v106_v50 = vcombine.high %v83_v41, %v97_v43  ;;  %v177_v51 = vcombine.high %v154_v44, %v168_v45  ;;  %v105_v52 = vcombine.low %v83_v41, %v97_v43  ;;  %v176_v53 = vcombine.low %v154_v44, %v168_v45  ;;  %v1399_v54 = vld [vmem:[%s1670_s0 + $0x58] ss:$14 sps:$4 sm:$0xff]   ;;  %v1402_v6 = vld [vmem:[#allocation2 + $0x130] sm:$0xff]  }
  0x1d   :  { %1245 = vmatpush3.bf16.msra.mxu1 %v1370_v15  ;;  %v90_v55 = vrot.slane %v1396_v47, %v1519_v36  ;;  %v104_v56 = vrot.slane %v1397_v48, %v1519_v36  ;;  %v175_v61 = vrot.slane %v1399_v54, %v1519_v36  ;;  %v1403_v7 = vld [vmem:[#allocation2 + $0x168] sm:$0xff]   ;;  %v1405_v9 = vld [vmem:[#allocation2 + $0x160] sm:$0xff]   ;;  %v1409_v14 = vld [vmem:[#allocation2 + $0x150] sm:$0xff]  }
  0x1e   :  { %1246 = vmatprep.subr.bf16.mxu1 %v1373_v18  ;;  %v230_v59 = vpack.c.bf16 %v177_v51, %v106_v50  ;;  %v229_v60 = vpack.c.bf16 %v176_v53, %v105_v52  ;;  %v1404_v8 = vld [vmem:[#allocation2 + $0x128] sm:$0xff]   ;;  %v1406_v10 = vld [vmem:[#allocation2 + $0x120] sm:$0xff]   ;;  %v1429_v47 = vld [vmem:[%s1673_s3 + $0x30] sm:$0xff]  }
  0x1f   :  { %1225 = vmatpush3.bf16.msra.mxu0 %v1372_v17  ;;  %v108_v63 = vcombine.high %v90_v55, %v104_v56  ;;  %v107_v0 = vcombine.low %v90_v55, %v104_v56  ;;  %v179_v2 = vcombine.high %v161_v57, %v175_v61  ;;  %v178_v3 = vcombine.low %v161_v57, %v175_v61  ;;  %v1415_v13 = vld [vmem:[#allocation2 + $0x180] sm:$0xff]   ;;  %v1416_v15 = vld [vmem:[%s1670_s0 + $0x8] ss:$14 sps:$4 sm:$0xff]   ;;  %v1418_v16 = vld [vmem:[%s1670_s0 + $0xc] ss:$14 sps:$4 sm:$0x33]  }
  0x20   :  { %1226 = vmatprep.subr.bf16.mxu0 %v1375_v20  ;;  %671 = vmatprep.mubr.bf16.mxu0 %v230_v59  ;;  %v1419_v17 = vld [vmem:[%s1670_s0 + $0x24] ss:$14 sps:$4 sm:$0xff]   ;;  %v1421_v18 = vld [vmem:[%s1670_s0 + $0x28] ss:$14 sps:$4 sm:$0x33]   ;;  %v119_v20 = vrot.slane %v1416_v15, %v1519_v36  ;;  %v1432_v50 = vld [vmem:[%s1673_s3 + $0x18] sm:$0xff]  }
  0x21   :  { %1247 = vmatpush3.bf16.msra.mxu1 %v1374_v19  ;;  %v232_v4 = vpack.c.bf16 %v179_v2, %v108_v63  ;;  %v231_v5 = vpack.c.bf16 %v178_v3, %v107_v0  ;;  %v1410_v19 = vld [vmem:[#allocation2 + $0x110] sm:$0xff]   ;;  %v1411_v24 = vld [vmem:[#allocation2 + $0x148] sm:$0xff]   ;;  %v133_v25 = vrot.slane %v1419_v17, %v1519_v36  ;;  %v140_v26 = vrot.slane %v1421_v18, %v1519_v36  ;;  %v1413_v37 = vld [vmem:[#allocation2 + $0x140] sm:$0xff]  }
  0x22   :  { %1248 = vmatprep.subr.bf16.mxu1 %v1377_v22  ;;  %v1422_v22 = vld [vmem:[%s1670_s0 + $0x40] ss:$14 sps:$4 sm:$0xff]   ;;  %v1436_v54 = vld [vmem:[%s1675_s5 + $0x38] sm:$0xff]  }
  0x23   :  { %1227 = vmatpush3.bf16.msra.mxu0 %v1376_v21  ;;  %712 = vmatprep.mubr.bf16.mxu1 %v232_v4  ;;  %v126_v21 = vrot.slane %v1418_v16, %v1519_v36  ;;  %v1412_v31 = vld [vmem:[#allocation2 + $0x108] sm:$0xff]   ;;  %v1414_v41 = vld [vmem:[#allocation2 + $0x100] sm:$0xff]   ;;  %v141_v44 = vcombine.low %v119_v20, %v133_v25  ;;  %v1433_v51 = vld [vmem:[%s1673_s3 + $0x10] sm:$0xff]  }
  0x24   :  { %1228 = vmatprep.subr.bf16.mxu0 %v1379_v27  ;;  %v1425_v27 = vld [vmem:[%s1670_s0 + $0x5c] ss:$14 sps:$4 sm:$0xff]   ;;  %v1431_v49 = vld [vmem:[%s1673_s3 + $0x20] sm:$0xff]   ;;  %v1437_v55 = vld [vmem:[%s1675_s5 + $0x30] sm:$0xff]  }
  0x25   :  { %1249 = vmatpush3.bf16.msra.mxu1 %v1378_v23  ;;  %v1424_v23 = vld [vmem:[%s1670_s0 + $0x44] ss:$14 sps:$4 sm:$0x33]   ;;  %v143_v38 = vcombine.low %v126_v21, %v140_v26  ;;  %v1430_v48 = vld [vmem:[%s1673_s3 + $0x28] sm:$0xff]   ;;  %v1440_v59 = vld [vmem:[%s1675_s5 + $0x18] sm:$0xff]  }
  0x26   :  { %1250 = vmatprep.subr.bf16.mxu1 %v1381_v29  ;;  %v190_v29 = vrot.slane %v1422_v22, %v1519_v36  ;;  %v1434_v52 = vld [vmem:[%s1673_s3 + $0x8] sm:$0xff]   ;;  %v1435_v53 = vld [vmem:[%s1673_s3] sm:$0xff]  }
  0x27   :  { %1229 = vmatpush3.bf16.msra.mxu0 %v1380_v28  ;;  %v1427_v28 = vld [vmem:[%s1670_s0 + $0x60] ss:$14 sps:$4 sm:$0x33]  }
  0x28   :  { %1230 = vmatprep.subr.bf16.mxu0 %v1383_v33  ;;  %v142_v33 = vcombine.high %v119_v20, %v133_v25  ;;  %v1438_v56 = vld [vmem:[%s1675_s5 + $0x28] sm:$0xff]   ;;  %v1439_v57 = vld [vmem:[%s1675_s5 + $0x20] sm:$0xff]  }
  0x29   :  { %1251 = vmatpush3.bf16.msra.mxu1 %v1382_v30  ;;  %v197_v30 = vrot.slane %v1424_v23, %v1519_v36 }
  0x2a   :  { %1252 = vmatprep.subr.bf16.mxu1 %v1385_v35  ;;  %v211_v35 = vrot.slane %v1427_v28, %v1519_v36 }
  0x2b   :  { %1231 = vmatpush3.bf16.msra.mxu0 %v1384_v34  ;;  %v204_v34 = vrot.slane %v1425_v27, %v1519_v36 }
  0x2c   :  { %1260 = vmatprep.subr.bf16.mxu0 %v1395_v46  ;;  %v214_v40 = vcombine.low %v197_v30, %v211_v35  ;;  %v1428_v46 = vld [vmem:[%s1673_s3 + $0x38] sm:$0xff]   ;;  %v1441_v30 = vld [vmem:[%s1675_s5 + $0x10] sm:$0xff]  }
  0x2d   :  { %1253 = vmatpush3.bf16.msra.mxu1 %v1394_v42  ;;  %v213_v39 = vcombine.high %v190_v29, %v204_v34  ;;  %v212_v45 = vcombine.low %v190_v29, %v204_v34  ;;  %v1193_v34 = vld [vmem:[%s1674_s4] ss:$0 sm:$0xff] }
  0x2e   :  { %1302 = vmatprep.subr.bf16.mxu1 %v1470_v58  ;;  %672 = vmatmul.mubr.bf16.vlgmr.msra.gmra.mxu0 %v229_v60  ;;  %v235_v43 = vpack.c.bf16 %v214_v40, %v143_v38 }
  0x2f   :  { %1261 = vmatpush3.bf16.msra.mxu0 %v1400_v62  ;;  %v234_v42 = vpack.c.bf16 %v213_v39, %v142_v33  ;;  %v233_v36 = vpack.c.bf16 %v212_v45, %v141_v44  ;;  %v1443_v33 = vld [vmem:[%s1675_s5] sm:$0xff]  }
  0x30   :  { %1262 = vmatprep.subr.bf16.mxu0 %v1401_v1  ;;  %713 = vmatmul.mubr.bf16.vlgmr.msra.gmra.mxu1 %v231_v5  ;;  %v1142_v5 = vld [vmem:[%s1672_s2] ss:$0 sm:$0xff] }
  0x31   :  { %1304 = vmatprep.mubr.msk.bf16.mxu1 %vm1471_vm0, %v1470_v58  ;;  %1303 = vmatpush3.bf16.msra.mxu1 %v1415_v13 }
  0x32   :  { %1308 = vmatprep.subr.bf16.mxu1 %v1470_v58  ;;  %753 = vmatprep.mubr.bf16.mxu0 %v234_v42 }
  0x33   :  { %1263 = vmatpush3.bf16.msra.mxu0 %v1402_v6 }
  0x34   :  { %1264 = vmatprep.subr.bf16.mxu0 %v1403_v7 }
  0x37   :  { %1265 = vmatpush3.bf16.msra.mxu0 %v1404_v8 }
  0x38   :  { %1266 = vmatprep.subr.bf16.mxu0 %v1405_v9  ;;  %1305 = vmatmul.mubr.msk.bf16.vlgmr.msra.gmra.mxu1 %vm635_vm1, %v235_v43 }
  0x39   :  { %1324 = vmatprep.mubr.msk.bf16.mxu1 %vm1471_vm0, %v1470_v58  ;;  %1309 = vmatpush3.bf16.msra.mxu1 %v1428_v46 }
  0x3a   :  { %1310 = vmatprep.subr.bf16.mxu1 %v1470_v58 }
  0x3b   :  { %1267 = vmatpush3.bf16.msra.mxu0 %v1406_v10 }
  0x3c   :  { %1268 = vmatprep.subr.bf16.mxu0 %v1407_v11 }
  0x3d   :  { %1311 = vmatpush3.bf16.msra.mxu1 %v1429_v47  ;;  %v1202_v47 = vld [vmem:[%s1676_s6] ss:$0 sm:$0xff] }
  0x3e   :  { %1312 = vmatprep.subr.bf16.mxu1 %v1470_v58 }
  0x3f   :  { %1269 = vmatpush3.bf16.msra.mxu0 %v1408_v12 }
  0x40   :  { %1270 = vmatprep.subr.bf16.mxu0 %v1409_v14 }
  0x41   :  { %1313 = vmatpush3.bf16.msra.mxu1 %v1430_v48 }
  0x42   :  { %1314 = vmatprep.subr.bf16.mxu1 %v1470_v58 }
  0x43   :  { %1271 = vmatpush3.bf16.msra.mxu0 %v1410_v19 }
  0x44   :  { %1272 = vmatprep.subr.bf16.mxu0 %v1411_v24 }
  0x45   :  { %1315 = vmatpush3.bf16.msra.mxu1 %v1431_v49 }
  0x46   :  { %1316 = vmatprep.subr.bf16.mxu1 %v1470_v58 }
  0x47   :  { %1273 = vmatpush3.bf16.msra.mxu0 %v1412_v31  ;;  %v1442_v31 = vld [vmem:[%s1675_s5 + $0x8] sm:$0xff]  }
  0x48   :  { %1274 = vmatprep.subr.bf16.mxu0 %v1413_v37 }
  0x49   :  { %1317 = vmatpush3.bf16.msra.mxu1 %v1432_v50 }
  0x4a   :  { %1318 = vmatprep.subr.bf16.mxu1 %v1470_v58 }
  0x4b   :  { %1275 = vmatpush3.bf16.msra.mxu0 %v1414_v41 }
  0x4c   :  { %1328 = vmatprep.subr.bf16.mxu0 %v1470_v58 }
  0x4d   :  { %1319 = vmatpush3.bf16.msra.mxu1 %v1433_v51 }
  0x4e   :  { %754 = vmatmul.mubr.bf16.vlgmr.msra.gmra.mxu0 %v233_v36  ;;  %1320 = vmatprep.subr.bf16.mxu1 %v1470_v58 }
  0x4f   :  { %1344 = vmatprep.mubr.msk.bf16.mxu0 %vm1471_vm0, %v1470_v58  ;;  %1329 = vmatpush3.bf16.msra.mxu0 %v1436_v54 }
  0x50   :  { %1330 = vmatprep.subr.bf16.mxu0 %v1470_v58 }
  0x51   :  { %1321 = vmatpush3.bf16.msra.mxu1 %v1434_v52 }
  0x52   :  { %1322 = vmatprep.subr.bf16.mxu1 %v1470_v58 }
  0x53   :  { %1331 = vmatpush3.bf16.msra.mxu0 %v1437_v55 }
  0x54   :  { %1332 = vmatprep.subr.bf16.mxu0 %v1470_v58 }
  0x55   :  { %1323 = vmatpush3.bf16.msra.mxu1 %v1435_v53 }
  0x57   :  { %1333 = vmatpush3.bf16.msra.mxu0 %v1438_v56 }
  0x58   :  { %1334 = vmatprep.subr.bf16.mxu0 %v1470_v58 }
  0x5b   :  { %1335 = vmatpush3.bf16.msra.mxu0 %v1439_v57 }
  0x5c   :  { %1336 = vmatprep.subr.bf16.mxu0 %v1470_v58 }
  0x5f   :  { %1337 = vmatpush3.bf16.msra.mxu0 %v1440_v59 }
  0x60   :  { %1338 = vmatprep.subr.bf16.mxu0 %v1470_v58 }
  0x63   :  { %1339 = vmatpush3.bf16.msra.mxu0 %v1441_v30 }
  0x64   :  { %1340 = vmatprep.subr.bf16.mxu0 %v1470_v58 }
  0x67   :  { %1341 = vmatpush3.bf16.msra.mxu0 %v1442_v31 }
  0x68   :  { %1342 = vmatprep.subr.bf16.mxu0 %v1470_v58  ;;  %v1472_v58 = vmov 1966171168  }
  0x69   :  { %v1037_v45 = vunpack.c.l.s4 %v1472_v58 }
  0x6b   :  { %1343 = vmatpush3.bf16.msra.mxu0 %v1443_v33  ;;  %v1038_v46 = vunpack.c.0.s8 %v1037_v45 }
  0x6d   :  { %v1041_v52 = vsub.s32 %v1038_v46, %v1516_v32 }
  0xee   :  { %v1232_v61 = vpop.f32.mrf.mxu0 }
  0xf0   :  { %v1254_v60 = vpop.f32.mrf.mxu1  ;;  %v1233_v63 = vpop.f32.mrf.mxu0 }
  0xf1   :  { %v1234_v4 = vadd.f32 %v1233_v63, %v1232_v61 }
  0xf2   :  { %v1255_v62 = vpop.f32.mrf.mxu1  ;;  %v1235_v1 = vpop.f32.mrf.mxu0 }
  0xf3   :  { %v674_v9 = vadd.f32 %v1234_v4, %v1142_v5  ;;  %v1256_v10 = vadd.f32 %v1255_v62, %v1254_v60 }
  0xf4   :  { %v1257_v0 = vpop.f32.mrf.mxu1  ;;  %v1236_v6 = vpop.f32.mrf.mxu0 }
  0xf5   :  { %v1237_v11 = vadd.f32 %v1236_v6, %v1235_v1  ;;  %v715_v15 = vadd.f32 %v1256_v10, %v674_v9 }
  0xf6   :  { %v1258_v2 = vpop.f32.mrf.mxu1 }
  0xf7   :  { %v677_v16 = vadd.f32 %v1237_v11, %v1142_v5  ;;  %v1259_v17 = vadd.f32 %v1258_v2, %v1257_v0 }
  0xf8   :  { %v796_v3 = vpop.f32.mrf.mxu1 }
  0xf9   :  { %v718_v22 = vadd.f32 %v1259_v17, %v677_v16 }
  0xfa   :  { %v1306_v7 = vpop.f32.mrf.mxu1 }
  0xfc   :  { %v799_v8 = vpop.f32.mrf.mxu1 }
  0xfe   :  { %v1307_v13 = vpop.f32.mrf.mxu1 }
 0x10e   :  { %v1276_v12 = vpop.f32.mrf.mxu0 }
 0x110   :  { %v1277_v14 = vpop.f32.mrf.mxu0 }
 0x111   :  { %v1278_v18 = vadd.f32 %v1277_v14, %v1276_v12 }
 0x112   :  { %v1279_v19 = vpop.f32.mrf.mxu0 }
 0x113   :  { %v756_v20 = vadd.f32 %v1278_v18, %v715_v15 }
 0x114   :  { %v1280_v21 = vpop.f32.mrf.mxu0 }
 0x115   :  { %v1281_v23 = vadd.f32 %v1280_v21, %v1279_v19  ;;  %v797_v24 = vadd.f32 %v796_v3, %v756_v20 }
 0x117   :  { %v759_v25 = vadd.f32 %v1281_v23, %v718_v22  ;;  %v803_v27 = vmax.f32 %v797_v24, 0.0 }
 0x119   :  { %v800_v26 = vadd.f32 %v799_v8, %v759_v25 }
 0x11b   :  { %v804_v28 = vmax.f32 %v800_v26, 0.0 }
 0x11d   :  { %v805_v29 = vpack.c.bf16 %v804_v28, %v803_v27 }
 0x11f   :  { %1325 = vmatmul.mubr.bf16.vlgmr.msra.gmra.mxu1 %v805_v29 }
 0x1df   :  { %v911_v35 = vpop.f32.mrf.mxu1 }
 0x1e0   :  { %v912_v38 = vadd.f32 %v1193_v34, %v911_v35 }
 0x1e1   :  { %v1326_v37 = vpop.f32.mrf.mxu1 }
 0x1e2   :  { %v918_v42 = vmax.f32 %v912_v38, 0.0 }
 0x1e3   :  { %v914_v39 = vpop.f32.mrf.mxu1 }
 0x1e4   :  { %v915_v40 = vadd.f32 %v1193_v34, %v914_v39 }
 0x1e5   :  { %v1327_v41 = vpop.f32.mrf.mxu1 }
 0x1e6   :  { %v919_v43 = vmax.f32 %v915_v40, 0.0 }
 0x1e8   :  { %v920_v44 = vpack.c.bf16 %v919_v43, %v918_v42 }
 0x1ea   :  { %1345 = vmatmul.mubr.bf16.vlgmr.msra.gmra.mxu0 %v920_v44 }
 0x2aa   :  { %v1026_v36 = vpop.f32.mrf.mxu0 }
 0x2ab   :  { %v1027_v50 = vadd.f32 %v1202_v47, %v1026_v36 }
 0x2ac   :  { %v1346_v48 = vpop.f32.mrf.mxu0 }
 0x2ae   :  { %v1029_v49 = vpop.f32.mrf.mxu0 }
 0x2af   :  { %v1030_v51 = vadd.f32 %v1202_v47, %v1029_v49 }
 0x2b0   :  { %v1347_v53 = vpop.f32.mrf.mxu0 }
 0x2b1   :  { %v1033_v54 = vpack.c.bf16 %v1030_v51, %v1027_v50 }
 0x2b3   :  { %v1042_v55 = vrot.slane %v1033_v54, %v1041_v52 }
 0x2b5   :  { %1212 = vst.sshfl [vmem:[#allocation4] sm:$0x1 pattern:$0x73625140] %v1042_v55 }
 0x2bc   :  { %v1118_v56 = vld [vmem:[#allocation4] sm:$0x1] }
 0x2bd   :  { %1119 = vst [vmem:[%s1677_s7] sm:$0x1] %v1118_v56 }
 0x2be   :  { %1137 = vsyncpa [#allocation3], 1 }

</bundles_post_ra>
